<compile_context>
chip_gen: v7x
topology: tpu7x:2x2x1
jax: 0.10.0
libtpu: 0.0.40
codegen_flags: <defaults>
</compile_context>

<pallas_src>
import functools

import jax
import jax.numpy as jnp
from jax.experimental import pallas as pl
from jax.experimental.pallas import tpu as pltpu


# ----------------------------------------------------------------------------
# Kernel 1: fused 4-layer GCN stack with tanh.
#   h_l = tanh(A_norm @ h_{l-1} @ W_l + b_l)
#   output = [h1 | h2 | h3 | h4_pad]  laid out lane-dense as (N, 128).
#   The last layer is logically (hidden -> 1); its weight/bias are zero-padded
#   to 32 output columns so cols 97..127 of the output are exactly 0.
# ----------------------------------------------------------------------------
def _gcn_stack_kernel(a_ref, x_ref,
                      w0_ref, b0_ref, w1_ref, b1_ref,
                      w2_ref, b2_ref, w3_ref, b3_ref, o_ref):
    a = a_ref[...]                                    # (N, N), loaded once

    def layer(h, w_ref, b_ref):
        z = jnp.dot(h, w_ref[...], preferred_element_type=jnp.float32)
        return jnp.tanh(
            jnp.dot(a, z, preferred_element_type=jnp.float32) + b_ref[...])

    h0 = layer(x_ref[...], w0_ref, b0_ref)            # (N, 32)
    h1 = layer(h0, w1_ref, b1_ref)                    # (N, 32)
    h2 = layer(h1, w2_ref, b2_ref)                    # (N, 32)
    h3 = layer(h2, w3_ref, b3_ref)                    # (N, 32) col 0 real, rest 0
    # Single lane-dense 128-wide unmasked store.
    o_ref[...] = jnp.concatenate([h0, h1, h2, h3], axis=-1)   # (N, 128)


def gcn_stack(a_norm, x0, *params):
    n = a_norm.shape[0]
    return pl.pallas_call(
        _gcn_stack_kernel,
        out_shape=jax.ShapeDtypeStruct((n, 128), jnp.float32),
        in_specs=[pl.BlockSpec(memory_space=pltpu.MemorySpace.VMEM)]
        * (2 + len(params)),
        out_specs=pl.BlockSpec(memory_space=pltpu.MemorySpace.VMEM),
    )(a_norm, x0, *params)


# ----------------------------------------------------------------------------
# Kernel 2: CNN head + MLP, vectorized over batch and conv windows.
#   xp : (B, K, 128)  sorted+pooled node features (real cols 0..96, rest 0)
#   w1 : (128, 16)    Conv1d(1,16,D,D) as a per-node matmul (zero rows 97..127)
#   b1 : (1, 16)
#   w2 : (KW*16, 32)  Conv1d(16,32,5,1) pre-reshaped for im2col at init
#   b2 : (1, 32)
#   wm1: (T*32, 128)  Linear(dense_dim, 128)  (rows permuted to t-major order)
#   wm2: (128, 8)     Linear(128, 1) column-padded to 8 (col 0 real)
# ----------------------------------------------------------------------------
def _head_kernel(xp_ref, w1_ref, b1_ref, w2_ref, b2_ref,
                 wm1_ref, bm1_ref, wm2_ref, bm2_ref, out_ref):
    B, K, Dp = xp_ref.shape
    C1 = w1_ref.shape[1]                # 16
    C2 = w2_ref.shape[1]                # 32
    KW = w2_ref.shape[0] // C1          # 5
    P = K // 2                          # positions after MaxPool1d(2,2)
    T = P - KW + 1                      # positions after conv2

    # --- Conv1d(1,16,D,D) + ReLU: one matmul over all B*K node positions ---
    x2d = xp_ref[...].reshape(B * K, Dp)                       # (B*K, 128)
    y1 = jnp.maximum(
        jnp.dot(x2d, w1_ref[...], preferred_element_type=jnp.float32)
        + b1_ref[...], 0.0)                                    # (B*K, 16)
    y1 = y1.reshape(B, K, C1)                                  # (B, K, 16)

    # --- MaxPool1d(2,2) over node positions (static contiguous slices) ---
    pooled = jnp.concatenate(
        [jnp.maximum(y1[:, 2 * p:2 * p + 1, :], y1[:, 2 * p + 1:2 * p + 2, :])
         for p in range(P)],
        axis=1)                                                # (B, P, 16)

    # --- Conv1d(16,32,5,1) + ReLU via im2col: one (B*T, KW*16) matmul ---
    im2col = jnp.concatenate(
        [pooled[:, o:o + T, :] for o in range(KW)], axis=-1)   # (B, T, KW*16)
    im2col = im2col.reshape(B * T, KW * C1)
    y2 = jnp.maximum(
        jnp.dot(im2col, w2_ref[...], preferred_element_type=jnp.float32)
        + b2_ref[...], 0.0)                                    # (B*T, 32)

    # Flatten per graph (t-major; wm1 rows were pre-permuted at init so this
    # matches PyTorch's channel-major .view flatten; identity when T == 1).
    feat = y2.reshape(B, T * C2)                               # (B, dense_dim)

    # --- MLP [dense_dim, 128, 1] (dropout omitted at inference) ---
    h = jnp.maximum(
        jnp.dot(feat, wm1_ref[...], preferred_element_type=jnp.float32)
        + bm1_ref[...], 0.0)                                   # (B, 128)
    out_ref[...] = (jnp.dot(h, wm2_ref[...],
                            preferred_element_type=jnp.float32)
                    + bm2_ref[...])                            # (B, 8)


def dgcnn_head(xp, w1, b1, w2, b2, wm1, bm1, wm2, bm2):
    B = xp.shape[0]
    out_pad = wm2.shape[1]
    return pl.pallas_call(
        _head_kernel,
        out_shape=jax.ShapeDtypeStruct((B, out_pad), jnp.float32),
        in_specs=[pl.BlockSpec(memory_space=pltpu.MemorySpace.VMEM)] * 9,
        out_specs=pl.BlockSpec(memory_space=pltpu.MemorySpace.VMEM),
    )(xp, w1, b1, w2, b2, wm1, bm1, wm2, bm2)


# ----------------------------------------------------------------------------
# Full DGCNN forward (fused GCN stack -> sort-pool -> CNN head), jit'd.
# ----------------------------------------------------------------------------
@functools.partial(jax.jit, static_argnames=("k", "n_per"))
def dgcnn_forward(a_norm, x0, gcn_params, head_params, *, k, n_per):
    N = a_norm.shape[0]
    B = N // n_per
    # fused GCN stack -> lane-dense (N, 128); real features are columns 0..96
    x_full = gcn_stack(a_norm, x0, *gcn_params)

    # SortAggregation (sort-pooling): per graph, sort nodes by the LAST real
    # feature channel (the 1-dim final GCN output = column 96), descending,
    # keep top-k.  Data-dependent sort stays in JAX glue.
    hidden = gcn_params[0].shape[1]
    sort_col = 3 * hidden                                        # == 96
    x_graphs = x_full.reshape(B, n_per, x_full.shape[-1])        # (B, n, 128)
    order = jnp.argsort(-x_graphs[:, :, sort_col], axis=1)[:, :k]
    xp = jnp.take_along_axis(x_graphs, order[:, :, None], axis=1)  # (B, k, 128)

    out = dgcnn_head(xp, *head_params)
    return out[:, :1]                                            # (B, 1) logits


if __name__ == "__main__":
    # --- small deterministic problem sizes ---
    B = 2            # graphs in the batch
    n_per = 16       # nodes per graph
    N = B * n_per
    F_in = 8         # one-hot DRNL label dim (= max_z + 1)
    hidden = 32
    num_layers = 3
    k = 10           # SortAggregation k (the max(10, .) floor in the module)
    D = hidden * num_layers + 1     # total_latent_dim = 97
    Dp = 128

    key = jax.random.PRNGKey(0)
    keys = jax.random.split(key, 24)

    def winit(kk, shape, scale=0.1):
        return scale * jax.random.normal(kk, shape, dtype=jnp.float32)

    # --- synthetic batched graph: block-diagonal symmetric adjacency ---
    a = jnp.zeros((N, N), jnp.float32)
    for g in range(B):
        blk = (jax.random.uniform(keys[g], (n_per, n_per)) < 0.3).astype(jnp.float32)
        blk = jnp.triu(blk, 1)
        blk = blk + blk.T
        a = a.at[g * n_per:(g + 1) * n_per, g * n_per:(g + 1) * n_per].set(blk)
    a_hat = a + jnp.eye(N, dtype=jnp.float32)
    d_inv_sqrt = 1.0 / jnp.sqrt(a_hat.sum(axis=1))
    a_norm = d_inv_sqrt[:, None] * a_hat * d_inv_sqrt[None, :]   # D^-1/2 (A+I) D^-1/2

    # node features = one-hot DRNL labels (matches SEALDataset.process semantics)
    z = jax.random.randint(keys[2], (N,), 0, F_in)
    x0 = jax.nn.one_hot(z, F_in, dtype=jnp.float32)

    # --- GCN stack params: F_in->h, h->h, h->h, h->1 (last ZERO-padded to 32) ---
    w0 = winit(keys[3], (F_in, hidden))
    w1g = winit(keys[4], (hidden, hidden))
    w2g = winit(keys[5], (hidden, hidden))
    w3g = jnp.zeros((hidden, hidden), jnp.float32).at[:, 0].set(
        winit(keys[6], (hidden,)))
    b0 = winit(keys[7], (1, hidden))
    b1g = winit(keys[8], (1, hidden))
    b2g = winit(keys[9], (1, hidden))
    b3g = jnp.zeros((1, hidden), jnp.float32).at[0, 0].set(
        winit(keys[10], (1,))[0])
    gcn_params = (w0, b0, w1g, b1g, w2g, b2g, w3g, b3g)

    # --- CNN head + MLP params ---
    c1, c2, kw2 = 16, 32, 5
    P = k // 2
    T = P - kw2 + 1
    dense_dim = T * c2               # == int((k-2)/2+1 - 5 + 1) * 32
    # Conv1d(1,16,97,97): W1[d, c] = torch_w1[c, 0, d]; zero rows 97..127.
    w1 = jnp.pad(winit(keys[11], (D, c1)), ((0, Dp - D), (0, 0)))
    b1 = winit(keys[12], (1, c1))
    # Conv1d(16,32,5,1): w2r[o*16 + c, c2] = torch_w2[c2, c, o]; pre-reshaped.
    w2 = winit(keys[13], (kw2, c1, c2)).reshape(kw2 * c1, c2)
    b2 = winit(keys[14], (1, c2))
    # Linear(dense_dim, 128): init in PyTorch channel-major row order, then
    # permute rows to the kernel's t-major flatten (identity for T == 1).
    wm1_cm = winit(keys[15], (dense_dim, 128))
    wm1 = wm1_cm.reshape(c2, T, 128).transpose(1, 0, 2).reshape(dense_dim, 128)
    bm1 = winit(keys[16], (1, 128))
    out_pad = 8                      # lane-pad final Linear(128, 1) -> 8 cols
    wm2 = jnp.zeros((128, out_pad), jnp.float32).at[:, 0].set(
        winit(keys[17], (128,)))
    bm2 = jnp.zeros((1, out_pad), jnp.float32).at[0, 0].set(
        winit(keys[18], (1,))[0])
    head_params = (w1, b1, w2, b2, wm1, bm1, wm2, bm2)

    logits = dgcnn_forward(a_norm, x0, gcn_params, head_params,
                           k=k, n_per=n_per)
    jax.block_until_ready(logits)
    assert logits.shape == (B, 1)
    print("KERNEL_OK")
</pallas_src>

<mosaic_0001>
module attributes {stable_mosaic.version = 11 : i64} {
  func.func @_gcn_stack_kernel(%arg0: memref<32x32xf32, #tpu.memory_space<vmem>>, %arg1: memref<32x8xf32, #tpu.memory_space<vmem>>, %arg2: memref<8x32xf32, #tpu.memory_space<vmem>>, %arg3: memref<1x32xf32, #tpu.memory_space<vmem>>, %arg4: memref<32x32xf32, #tpu.memory_space<vmem>>, %arg5: memref<1x32xf32, #tpu.memory_space<vmem>>, %arg6: memref<32x32xf32, #tpu.memory_space<vmem>>, %arg7: memref<1x32xf32, #tpu.memory_space<vmem>>, %arg8: memref<32x32xf32, #tpu.memory_space<vmem>>, %arg9: memref<1x32xf32, #tpu.memory_space<vmem>>, %arg10: memref<32x128xf32, #tpu.memory_space<vmem>>) attributes {dimension_semantics = [], scalar_prefetch = 0 : i64, scratch_operands = 0 : i64, tpu.core_type = #tpu.core_type<tc>} {
    %c0 = arith.constant 0 : index
    %c0_0 = arith.constant 0 : index
    %0 = vector.load %arg0[%c0, %c0_0] : memref<32x32xf32, #tpu.memory_space<vmem>>, vector<32x32xf32>
    %c0_1 = arith.constant 0 : index
    %c0_2 = arith.constant 0 : index
    %1 = vector.load %arg1[%c0_1, %c0_2] : memref<32x8xf32, #tpu.memory_space<vmem>>, vector<32x8xf32>
    %c0_3 = arith.constant 0 : index
    %c0_4 = arith.constant 0 : index
    %2 = vector.load %arg2[%c0_3, %c0_4] : memref<8x32xf32, #tpu.memory_space<vmem>>, vector<8x32xf32>
    %cst = arith.constant dense<0.000000e+00> : vector<32x32xf32>
    %3 = tpu.matmul %1, %2, %cst {dimension_numbers = #tpu.dot_dimension_numbers<[1], [0], [0], [1], [0, 0, 1, 1], [], []>} : vector<32x8xf32>, vector<8x32xf32>, vector<32x32xf32> -> vector<32x32xf32>
    %cst_5 = arith.constant dense<0.000000e+00> : vector<32x32xf32>
    %4 = tpu.matmul %0, %3, %cst_5 {dimension_numbers = #tpu.dot_dimension_numbers<[1], [0], [0], [1], [0, 0, 1, 1], [], []>} : vector<32x32xf32>, vector<32x32xf32>, vector<32x32xf32> -> vector<32x32xf32>
    %c0_6 = arith.constant 0 : index
    %c0_7 = arith.constant 0 : index
    %5 = vector.load %arg3[%c0_6, %c0_7] : memref<1x32xf32, #tpu.memory_space<vmem>>, vector<1x32xf32>
    %6 = vector.broadcast %5 : vector<1x32xf32> to vector<32x32xf32>
    %7 = arith.addf %4, %6 : vector<32x32xf32>
    %8 = math.tanh %7 : vector<32x32xf32>
    %c0_8 = arith.constant 0 : index
    %c0_9 = arith.constant 0 : index
    %9 = vector.load %arg4[%c0_8, %c0_9] : memref<32x32xf32, #tpu.memory_space<vmem>>, vector<32x32xf32>
    %cst_10 = arith.constant dense<0.000000e+00> : vector<32x32xf32>
    %10 = tpu.matmul %8, %9, %cst_10 {dimension_numbers = #tpu.dot_dimension_numbers<[1], [0], [0], [1], [0, 0, 1, 1], [], []>} : vector<32x32xf32>, vector<32x32xf32>, vector<32x32xf32> -> vector<32x32xf32>
    %cst_11 = arith.constant dense<0.000000e+00> : vector<32x32xf32>
    %11 = tpu.matmul %0, %10, %cst_11 {dimension_numbers = #tpu.dot_dimension_numbers<[1], [0], [0], [1], [0, 0, 1, 1], [], []>} : vector<32x32xf32>, vector<32x32xf32>, vector<32x32xf32> -> vector<32x32xf32>
    %c0_12 = arith.constant 0 : index
    %c0_13 = arith.constant 0 : index
    %12 = vector.load %arg5[%c0_12, %c0_13] : memref<1x32xf32, #tpu.memory_space<vmem>>, vector<1x32xf32>
    %13 = vector.broadcast %12 : vector<1x32xf32> to vector<32x32xf32>
    %14 = arith.addf %11, %13 : vector<32x32xf32>
    %15 = math.tanh %14 : vector<32x32xf32>
    %c0_14 = arith.constant 0 : index
    %c0_15 = arith.constant 0 : index
    %16 = vector.load %arg6[%c0_14, %c0_15] : memref<32x32xf32, #tpu.memory_space<vmem>>, vector<32x32xf32>
    %cst_16 = arith.constant dense<0.000000e+00> : vector<32x32xf32>
    %17 = tpu.matmul %15, %16, %cst_16 {dimension_numbers = #tpu.dot_dimension_numbers<[1], [0], [0], [1], [0, 0, 1, 1], [], []>} : vector<32x32xf32>, vector<32x32xf32>, vector<32x32xf32> -> vector<32x32xf32>
    %cst_17 = arith.constant dense<0.000000e+00> : vector<32x32xf32>
    %18 = tpu.matmul %0, %17, %cst_17 {dimension_numbers = #tpu.dot_dimension_numbers<[1], [0], [0], [1], [0, 0, 1, 1], [], []>} : vector<32x32xf32>, vector<32x32xf32>, vector<32x32xf32> -> vector<32x32xf32>
    %c0_18 = arith.constant 0 : index
    %c0_19 = arith.constant 0 : index
    %19 = vector.load %arg7[%c0_18, %c0_19] : memref<1x32xf32, #tpu.memory_space<vmem>>, vector<1x32xf32>
    %20 = vector.broadcast %19 : vector<1x32xf32> to vector<32x32xf32>
    %21 = arith.addf %18, %20 : vector<32x32xf32>
    %22 = math.tanh %21 : vector<32x32xf32>
    %c0_20 = arith.constant 0 : index
    %c0_21 = arith.constant 0 : index
    %23 = vector.load %arg8[%c0_20, %c0_21] : memref<32x32xf32, #tpu.memory_space<vmem>>, vector<32x32xf32>
    %cst_22 = arith.constant dense<0.000000e+00> : vector<32x32xf32>
    %24 = tpu.matmul %22, %23, %cst_22 {dimension_numbers = #tpu.dot_dimension_numbers<[1], [0], [0], [1], [0, 0, 1, 1], [], []>} : vector<32x32xf32>, vector<32x32xf32>, vector<32x32xf32> -> vector<32x32xf32>
    %cst_23 = arith.constant dense<0.000000e+00> : vector<32x32xf32>
    %25 = tpu.matmul %0, %24, %cst_23 {dimension_numbers = #tpu.dot_dimension_numbers<[1], [0], [0], [1], [0, 0, 1, 1], [], []>} : vector<32x32xf32>, vector<32x32xf32>, vector<32x32xf32> -> vector<32x32xf32>
    %c0_24 = arith.constant 0 : index
    %c0_25 = arith.constant 0 : index
    %26 = vector.load %arg9[%c0_24, %c0_25] : memref<1x32xf32, #tpu.memory_space<vmem>>, vector<1x32xf32>
    %27 = vector.broadcast %26 : vector<1x32xf32> to vector<32x32xf32>
    %28 = arith.addf %25, %27 : vector<32x32xf32>
    %29 = math.tanh %28 : vector<32x32xf32>
    %30 = tpu.concatenate %8, %15, %22, %29 in 1 : vector<32x32xf32>, vector<32x32xf32>, vector<32x32xf32>, vector<32x32xf32> -> vector<32x128xf32>
    %c0_26 = arith.constant 0 : index
    %c0_27 = arith.constant 0 : index
    %31 = vector.load %arg10[%c0_26, %c0_27] : memref<32x128xf32, #tpu.memory_space<vmem>>, vector<32x128xf32>
    tpu.vector_store %arg10[%c0_26, %c0_27], %30 {strides = array<i32>} : memref<32x128xf32, #tpu.memory_space<vmem>>, vector<32x128xf32>,
    return
  }
}

module attributes {stable_mosaic.version = 11 : i64} {
  func.func @_head_kernel(%arg0: memref<2x10x128xf32, #tpu.memory_space<vmem>>, %arg1: memref<128x16xf32, #tpu.memory_space<vmem>>, %arg2: memref<1x16xf32, #tpu.memory_space<vmem>>, %arg3: memref<80x32xf32, #tpu.memory_space<vmem>>, %arg4: memref<1x32xf32, #tpu.memory_space<vmem>>, %arg5: memref<32x128xf32, #tpu.memory_space<vmem>>, %arg6: memref<1x128xf32, #tpu.memory_space<vmem>>, %arg7: memref<128x8xf32, #tpu.memory_space<vmem>>, %arg8: memref<1x8xf32, #tpu.memory_space<vmem>>, %arg9: memref<2x8xf32, #tpu.memory_space<vmem>>) attributes {dimension_semantics = [], scalar_prefetch = 0 : i64, scratch_operands = 0 : i64, tpu.core_type = #tpu.core_type<tc>} {
    %c0 = arith.constant 0 : index
    %c0_0 = arith.constant 0 : index
    %c0_1 = arith.constant 0 : index
    %0 = vector.load %arg0[%c0, %c0_0, %c0_1] : memref<2x10x128xf32, #tpu.memory_space<vmem>>, vector<2x10x128xf32>
    %1 = vector.shape_cast %0 : vector<2x10x128xf32> to vector<20x128xf32>
    %c0_2 = arith.constant 0 : index
    %c0_3 = arith.constant 0 : index
    %2 = vector.load %arg1[%c0_2, %c0_3] : memref<128x16xf32, #tpu.memory_space<vmem>>, vector<128x16xf32>
    %cst = arith.constant dense<0.000000e+00> : vector<20x16xf32>
    %3 = tpu.matmul %1, %2, %cst {dimension_numbers = #tpu.dot_dimension_numbers<[1], [0], [0], [1], [0, 0, 1, 1], [], []>} : vector<20x128xf32>, vector<128x16xf32>, vector<20x16xf32> -> vector<20x16xf32>
    %c0_4 = arith.constant 0 : index
    %c0_5 = arith.constant 0 : index
    %4 = vector.load %arg2[%c0_4, %c0_5] : memref<1x16xf32, #tpu.memory_space<vmem>>, vector<1x16xf32>
    %5 = vector.broadcast %4 : vector<1x16xf32> to vector<20x16xf32>
    %6 = arith.addf %3, %5 : vector<20x16xf32>
    %cst_6 = arith.constant 0.000000e+00 : f32
    %7 = vector.broadcast %cst_6 : f32 to vector<20x16xf32>
    %8 = arith.maximumf %6, %7 : vector<20x16xf32>
    %9 = vector.shape_cast %8 : vector<20x16xf32> to vector<2x10x16xf32>
    %10 = vector.extract_strided_slice %9 {offsets = [0, 0, 0], sizes = [2, 1, 16], strides = [1, 1, 1]} : vector<2x10x16xf32> to vector<2x1x16xf32>
    %11 = vector.extract_strided_slice %9 {offsets = [0, 1, 0], sizes = [2, 1, 16], strides = [1, 1, 1]} : vector<2x10x16xf32> to vector<2x1x16xf32>
    %12 = arith.maximumf %10, %11 : vector<2x1x16xf32>
    %13 = vector.extract_strided_slice %9 {offsets = [0, 2, 0], sizes = [2, 1, 16], strides = [1, 1, 1]} : vector<2x10x16xf32> to vector<2x1x16xf32>
    %14 = vector.extract_strided_slice %9 {offsets = [0, 3, 0], sizes = [2, 1, 16], strides = [1, 1, 1]} : vector<2x10x16xf32> to vector<2x1x16xf32>
    %15 = arith.maximumf %13, %14 : vector<2x1x16xf32>
    %16 = vector.extract_strided_slice %9 {offsets = [0, 4, 0], sizes = [2, 1, 16], strides = [1, 1, 1]} : vector<2x10x16xf32> to vector<2x1x16xf32>
    %17 = vector.extract_strided_slice %9 {offsets = [0, 5, 0], sizes = [2, 1, 16], strides = [1, 1, 1]} : vector<2x10x16xf32> to vector<2x1x16xf32>
    %18 = arith.maximumf %16, %17 : vector<2x1x16xf32>
    %19 = vector.extract_strided_slice %9 {offsets = [0, 6, 0], sizes = [2, 1, 16], strides = [1, 1, 1]} : vector<2x10x16xf32> to vector<2x1x16xf32>
    %20 = vector.extract_strided_slice %9 {offsets = [0, 7, 0], sizes = [2, 1, 16], strides = [1, 1, 1]} : vector<2x10x16xf32> to vector<2x1x16xf32>
    %21 = arith.maximumf %19, %20 : vector<2x1x16xf32>
    %22 = vector.extract_strided_slice %9 {offsets = [0, 8, 0], sizes = [2, 1, 16], strides = [1, 1, 1]} : vector<2x10x16xf32> to vector<2x1x16xf32>
    %23 = vector.extract_strided_slice %9 {offsets = [0, 9, 0], sizes = [2, 1, 16], strides = [1, 1, 1]} : vector<2x10x16xf32> to vector<2x1x16xf32>
    %24 = arith.maximumf %22, %23 : vector<2x1x16xf32>
    %25 = tpu.concatenate %12, %15, %18, %21, %24 in 1 : vector<2x1x16xf32>, vector<2x1x16xf32>, vector<2x1x16xf32>, vector<2x1x16xf32>, vector<2x1x16xf32> -> vector<2x5x16xf32>
    %26 = vector.extract_strided_slice %25 {offsets = [0, 0, 0], sizes = [2, 1, 16], strides = [1, 1, 1]} : vector<2x5x16xf32> to vector<2x1x16xf32>
    %27 = vector.extract_strided_slice %25 {offsets = [0, 1, 0], sizes = [2, 1, 16], strides = [1, 1, 1]} : vector<2x5x16xf32> to vector<2x1x16xf32>
    %28 = vector.extract_strided_slice %25 {offsets = [0, 2, 0], sizes = [2, 1, 16], strides = [1, 1, 1]} : vector<2x5x16xf32> to vector<2x1x16xf32>
    %29 = vector.extract_strided_slice %25 {offsets = [0, 3, 0], sizes = [2, 1, 16], strides = [1, 1, 1]} : vector<2x5x16xf32> to vector<2x1x16xf32>
    %30 = vector.extract_strided_slice %25 {offsets = [0, 4, 0], sizes = [2, 1, 16], strides = [1, 1, 1]} : vector<2x5x16xf32> to vector<2x1x16xf32>
    %31 = tpu.concatenate %26, %27, %28, %29, %30 in 2 : vector<2x1x16xf32>, vector<2x1x16xf32>, vector<2x1x16xf32>, vector<2x1x16xf32>, vector<2x1x16xf32> -> vector<2x1x80xf32>
    %32 = vector.shape_cast %31 : vector<2x1x80xf32> to vector<2x80xf32>
    %c0_7 = arith.constant 0 : index
    %c0_8 = arith.constant 0 : index
    %33 = vector.load %arg3[%c0_7, %c0_8] : memref<80x32xf32, #tpu.memory_space<vmem>>, vector<80x32xf32>
    %cst_9 = arith.constant dense<0.000000e+00> : vector<2x32xf32>
    %34 = tpu.matmul %32, %33, %cst_9 {dimension_numbers = #tpu.dot_dimension_numbers<[1], [0], [0], [1], [0, 0, 1, 1], [], []>} : vector<2x80xf32>, vector<80x32xf32>, vector<2x32xf32> -> vector<2x32xf32>
    %c0_10 = arith.constant 0 : index
    %c0_11 = arith.constant 0 : index
    %35 = vector.load %arg4[%c0_10, %c0_11] : memref<1x32xf32, #tpu.memory_space<vmem>>, vector<1x32xf32>
    %36 = vector.broadcast %35 : vector<1x32xf32> to vector<2x32xf32>
    %37 = arith.addf %34, %36 : vector<2x32xf32>
    %cst_12 = arith.constant 0.000000e+00 : f32
    %38 = vector.broadcast %cst_12 : f32 to vector<2x32xf32>
    %39 = arith.maximumf %37, %38 : vector<2x32xf32>
    %c0_13 = arith.constant 0 : index
    %c0_14 = arith.constant 0 : index
    %40 = vector.load %arg5[%c0_13, %c0_14] : memref<32x128xf32, #tpu.memory_space<vmem>>, vector<32x128xf32>
    %cst_15 = arith.constant dense<0.000000e+00> : vector<2x128xf32>
    %41 = tpu.matmul %39, %40, %cst_15 {dimension_numbers = #tpu.dot_dimension_numbers<[1], [0], [0], [1], [0, 0, 1, 1], [], []>} : vector<2x32xf32>, vector<32x128xf32>, vector<2x128xf32> -> vector<2x128xf32>
    %c0_16 = arith.constant 0 : index
    %c0_17 = arith.constant 0 : index
    %42 = vector.load %arg6[%c0_16, %c0_17] : memref<1x128xf32, #tpu.memory_space<vmem>>, vector<1x128xf32>
    %43 = vector.broadcast %42 : vector<1x128xf32> to vector<2x128xf32>
    %44 = arith.addf %41, %43 : vector<2x128xf32>
    %cst_18 = arith.constant 0.000000e+00 : f32
    %45 = vector.broadcast %cst_18 : f32 to vector<2x128xf32>
    %46 = arith.maximumf %44, %45 : vector<2x128xf32>
    %c0_19 = arith.constant 0 : index
    %c0_20 = arith.constant 0 : index
    %47 = vector.load %arg7[%c0_19, %c0_20] : memref<128x8xf32, #tpu.memory_space<vmem>>, vector<128x8xf32>
    %cst_21 = arith.constant dense<0.000000e+00> : vector<2x8xf32>
    %48 = tpu.matmul %46, %47, %cst_21 {dimension_numbers = #tpu.dot_dimension_numbers<[1], [0], [0], [1], [0, 0, 1, 1], [], []>} : vector<2x128xf32>, vector<128x8xf32>, vector<2x8xf32> -> vector<2x8xf32>
    %c0_22 = arith.constant 0 : index
    %c0_23 = arith.constant 0 : index
    %49 = vector.load %arg8[%c0_22, %c0_23] : memref<1x8xf32, #tpu.memory_space<vmem>>, vector<1x8xf32>
    %50 = vector.broadcast %49 : vector<1x8xf32> to vector<2x8xf32>
    %51 = arith.addf %48, %50 : vector<2x8xf32>
    %c0_24 = arith.constant 0 : index
    %c0_25 = arith.constant 0 : index
    %52 = vector.load %arg9[%c0_24, %c0_25] : memref<2x8xf32, #tpu.memory_space<vmem>>, vector<2x8xf32>
    tpu.vector_store %arg9[%c0_24, %c0_25], %51 {strides = array<i32>} : memref<2x8xf32, #tpu.memory_space<vmem>>, vector<2x8xf32>,
    return
  }
}

</mosaic_0001>

<bundles_post_ra>
// kernel: dgcnn_forward.2
= control target key start
LH: loop header
LB: loop body
LE: loop exit
PB: predicated region body
PF: predicated region fallthrough
CT: control target
= control target key end

     0   :  { %15 = vsyncpa [#allocation3], 0  ;;  %s1563_s0 = inlined_call_operand.vmem [shape: f32[32,32], index: 0, kind: input, shape index: {}]   ;;  %s1564_s1 = inlined_call_operand.vmem [shape: f32[32,8], index: 1, kind: input, shape index: {}]   ;;  %s1565_s2 = inlined_call_operand.hbm [shape: f32[8,32], index: 2, kind: input, shape index: {}]   ;;  %s1566_s3 = inlined_call_operand.vmem [shape: f32[1,32], index: 3, kind: input, shape index: {}]   ;;  %s1567_s4 = inlined_call_operand.vmem [shape: f32[32,32], index: 4, kind: input, shape index: {}]   ;;  %s1568_s5 = inlined_call_operand.vmem [shape: f32[1,32], index: 5, kind: input, shape index: {}]   ;;  %s1569_s6 = inlined_call_operand.hbm [shape: f32[32,32], index: 6, kind: input, shape index: {}]   ;;  %s1570_s7 = inlined_call_operand.vmem [shape: f32[1,32], index: 7, kind: input, shape index: {}]   ;;  %s1571_s8 = inlined_call_operand.hbm [shape: f32[32,32], index: 8, kind: input, shape index: {}]   ;;  %s1572_s9 = inlined_call_operand.vmem [shape: f32[1,32], index: 9, kind: input, shape index: {}]   ;;  %s1573_s10 = inlined_call_operand.vmem [shape: f32[32,128], index: 10, kind: output, shape index: {}]  }
   0x1   :  { %16 = vsyncpa [#allocation5], 0  ;;  %s1318_s13 = smov [#allocation4]   ;;  %s1248_s17 = scalar_lea.hbm %s1569_s6, 512 }
   0x2   :  { %s42_s14 = sshll.u32 %s1318_s13, 4  ;;  %p1249_p0 = scmp.ne.s32.totalorder %s1569_s6, %s1248_s17  ;;  %s43_s14 = int_to_ptr.vmem [resolvable:$true] %s42_s14 }
   0x3   :  { %p1252_p1 = scmp.lt.u32.totalorder %s1248_s17, %s1569_s6 }
   0x5   :  { %p1254_p2 = pnand %p1252_p1, %p1249_p0 }
   0x7   :  { %1257 = shalt.err (!%p1254_p2)
}
   0x8   :  { %s1258_s22 = scalar_lea.vmem %s43_s14, 512  ;;  %p1263_p4 = scmp.lt.s32.totalorder %s43_s14, %s43_s14 }
   0x9   :  { %p1259_p3 = scmp.ne.s32.totalorder %s43_s14, %s1258_s22  ;;  %p1264_p5 = scmp.lt.s32.totalorder %s1258_s22, %s1258_s22 }
   0xb   :  { %p1265_p6 = por %p1264_p5, %p1263_p4 }
   0xd   :  { %p1266_p7 = pnand %p1265_p6, %p1259_p3 }
   0xf   :  { %1269 = shalt.err (!%p1266_p7)
}
  0x10   :  { %s1319_s23 = smov 128   ;;  %s1320_s24 = smov 8  }
  0x11   :  { %48 = dma.hbm_to_vmem [thread:$0]  %s1569_s6, 512, %s43_s14, [#allocation5], %s1319_s23, %s1319_s23, %s1320_s24  }
  0x12   :  { %s1321_s27 = smov [#allocation2]   ;;  %s1322_s29 = smov [#allocation6]  }
  0x13   :  { %s27_s28 = sshll.u32 %s1321_s27, 4  ;;  %s56_s30 = sshll.u32 %s1322_s29, 4  ;;  %s28_s28 = int_to_ptr.vmem [resolvable:$true] %s27_s28  ;;  %s57_s30 = int_to_ptr.vmem [resolvable:$true] %s56_s30 }
  0x14   :  { %s1270_s13 = scalar_lea.hbm %s1565_s2, 128 }
  0x15   :  { %p1271_p8 = scmp.ne.s32.totalorder %s1565_s2, %s1270_s13  ;;  %p1274_p9 = scmp.lt.u32.totalorder %s1270_s13, %s1565_s2 }
  0x17   :  { %p1276_p10 = pnand %p1274_p9, %p1271_p8 }
  0x19   :  { %1279 = shalt.err (!%p1276_p10)
}
  0x1a   :  { %s1280_s6 = scalar_lea.vmem %s28_s28, 128  ;;  %p1285_p12 = scmp.lt.s32.totalorder %s28_s28, %s28_s28 }
  0x1b   :  { %p1281_p11 = scmp.ne.s32.totalorder %s28_s28, %s1280_s6  ;;  %p1286_p13 = scmp.lt.s32.totalorder %s1280_s6, %s1280_s6 }
  0x1d   :  { %p1287_p0 = por %p1286_p13, %p1285_p12 }
  0x1f   :  { %p1288_p1 = pnand %p1287_p0, %p1281_p11 }
  0x21   :  { %1291 = shalt.err (!%p1288_p1)
}
  0x22   :  { %30 = dma.hbm_to_vmem [thread:$0]  %s1565_s2, 128, %s28_s28, [#allocation3]  }
  0x23   :  { %s1292_s22 = scalar_lea.hbm %s1571_s8, 512 }
  0x24   :  { %p1293_p2 = scmp.ne.s32.totalorder %s1571_s8, %s1292_s22  ;;  %p1296_p3 = scmp.lt.u32.totalorder %s1292_s22, %s1571_s8 }
  0x26   :  { %p1298_p4 = pnand %p1296_p3, %p1293_p2 }
  0x28   :  { %1301 = shalt.err (!%p1298_p4)
}
  0x29   :  { %s1302_s11 = scalar_lea.vmem %s57_s30, 512  ;;  %p1307_p6 = scmp.lt.s32.totalorder %s57_s30, %s57_s30 }
  0x2a   :  { %p1303_p5 = scmp.ne.s32.totalorder %s57_s30, %s1302_s11  ;;  %p1308_p7 = scmp.lt.s32.totalorder %s1302_s11, %s1302_s11 }
  0x2c   :  { %p1309_p8 = por %p1308_p7, %p1307_p6 }
  0x2e   :  { %p1310_p9 = pnand %p1309_p8, %p1303_p5 }
  0x30   :  { %1313 = shalt.err (!%p1310_p9)
}
  0x31   :  { %62 = dma.hbm_to_vmem [thread:$0]  %s1571_s8, 512, %s57_s30, [#allocation5], %s1319_s23, %s1319_s23, %s1320_s24  }
  0x32   :  { %1314 = dma.done.wait [#allocation3], 128  }
  0x33   :  { %1315 = vsyncadd [#allocation3], 4294967168 }
  0x34   :  { %1316 = dma.done.wait [#allocation5], 1024  }
  0x35   :  { %1317 = vsyncadd [#allocation5], 4294966272  ;;  %vm83_vm0 = vcmask 64512   ;;  %v82_v0 = vld [vmem:[#allocation2] sm:$0xff]  ;;  %v79_v2 = vld [vmem:[%s1564_s1 + $0x8] sm:$0xff]  ;;  %vm188_vm1 = vcmask 261120  }
  0x36   :  { %v78_v1 = vld [vmem:[%s1564_s1] sm:$0xff]  ;;  %1042 = vmatprep.subr.mxu0 %v82_v0  ;;  %v80_v3 = vld [vmem:[%s1564_s1 + $0x10] sm:$0xff]  ;;  %v81_v4 = vld [vmem:[%s1564_s1 + $0x18] sm:$0xff]  ;;  %s1323_s13 = smov 32   ;;  %s1324_s16 = smov 64   ;;  %vm925_vm2 = vcmask 523264  }
  0x37   :  { %1044 = vmatprep.mubr.msk.f32.mxu0 %vm83_vm0, %v78_v1  ;;  %1043 = vmatpush3.msra.mxu0 %v82_v0  ;;  %v1438_v5 = vld [vmem:[%s1563_s0] sm:$0xff]  ;;  %v1445_v12 = vld [vmem:[%s1563_s0 + $0x8] sm:$0xff]  ;;  %v1450_v13 = vld [vmem:[%s1563_s0 + $0x10] sm:$0xff]  ;;  %s1325_s18 = smov 96   ;;  %vm930_vm3 = vcmask 785408  }
  0x38   :  { %1045 = vmatmul.mubr.msk.f32.vlgmr.msra.gmra.mrb[0].mxu0 %vm83_vm0, %v79_v2  ;;  %1058 = vmatprep.mubr.msk.f32.mxu1 %vm188_vm1, %v1438_v5  ;;  %v1459_v14 = vld [vmem:[%s1563_s0 + $0x18] sm:$0xff]  ;;  %v290_v15 = vld [vmem:[%s1567_s4] sm:$0xff]  ;;  %v291_v16 = vld [vmem:[%s1567_s4 + $0x8] sm:$0xff] }
  0x39   :  { %1047 = vmatprep.mubr.msk.f32.mxu0 %vm83_vm0, %v80_v3  ;;  %v1156_v17 = vpack.c.bf16 %v291_v16, %v290_v15  ;;  %v292_v18 = vld [vmem:[%s1567_s4 + $0x10] sm:$0xff]  ;;  %v293_v19 = vld [vmem:[%s1567_s4 + $0x18] sm:$0xff]  ;;  %v949_v21 = vld [vmem:[%s1566_s3] ss:$0 sm:$0xff] }
  0x3a   :  { %v1160_v20 = vpack.c.bf16 %v293_v19, %v292_v18  ;;  %v487_v40 = vld [vmem:[#allocation4] sm:$0xff]  ;;  %v488_v41 = vld [vmem:[#allocation4 + $0x8] sm:$0xff]  ;;  %v489_v43 = vld [vmem:[#allocation4 + $0x10] sm:$0xff] }
  0x3b   :  { %1157 = vmatprep.subr.bf16.mxu0 %v1156_v17  ;;  %v1172_v42 = vpack.c.bf16 %v488_v41, %v487_v40  ;;  %v490_v44 = vld [vmem:[#allocation4 + $0x18] sm:$0xff]  ;;  %v684_v1 = vld [vmem:[#allocation6] sm:$0xff]  ;;  %v685_v2 = vld [vmem:[#allocation6 + $0x8] sm:$0xff] }
  0x3c   :  { %1048 = vmatmul.mubr.msk.f32.gmra.mrb[2].mxu0 %vm83_vm0, %v81_v4  ;;  %v1176_v45 = vpack.c.bf16 %v490_v44, %v489_v43  ;;  %v958_v46 = vld [vmem:[%s1568_s5] ss:$0 sm:$0xff]  ;;  %v1188_v3 = vpack.c.bf16 %v685_v2, %v684_v1  ;;  %v686_v4 = vld [vmem:[#allocation6 + $0x10] sm:$0xff] }
  0x3d   :  { %1159 = vmatpush3.bf16.msra.mxu0 %v1156_v17 }
  0x3e   :  { %1161 = vmatprep.subr.bf16.mxu0 %v1160_v20 }
  0x41   :  { %1163 = vmatpush3.bf16.msra.mxu0 %v1160_v20 }
  0x42   :  { %1173 = vmatprep.subr.bf16.mxu0 %v1172_v42 }
 0x10b   :  { %v1046_v6 = vpop.f32.mrb[0].mxu0 }
 0x10c   :  { %v162_v7 = vpop.f32.mrb[1].mxu0 }
 0x10d   :  { %v1148_v8 = vpack.c.bf16 %v1046_v6, %v162_v7  ;;  %v687_v6 = vld [vmem:[#allocation6 + $0x18] sm:$0xff] }
 0x10e   :  { %v1192_v7 = vpack.c.bf16 %v687_v6, %v686_v4 }
 0x10f   :  { %v1049_v9 = vpop.f32.mrb[2].mxu0  ;;  %1149 = vmatprep.subr.bf16.mxu1 %v1148_v8 }
 0x110   :  { %v172_v10 = vpop.f32.mrb[3].mxu0  ;;  %1151 = vmatpush3.bf16.msra.mxu1 %v1148_v8  ;;  %v967_v8 = vld [vmem:[%s1570_s7] ss:$0 sm:$0xff] }
 0x111   :  { %v1152_v11 = vpack.c.bf16 %v1049_v9, %v172_v10 }
 0x113   :  { %1153 = vmatprep.subr.bf16.mxu1 %v1152_v11 }
 0x114   :  { %1155 = vmatpush3.bf16.msra.mxu1 %v1152_v11 }
 0x117   :  { %1059 = vmatmul.mubr.msk.f32.vlgmr.msra.gmra.mrb[0].mxu1 %vm188_vm1, %v1445_v12 }
 0x118   :  { %1061 = vmatprep.mubr.msk.f32.mxu1 %vm188_vm1, %v1450_v13 }
 0x11b   :  { %1062 = vmatmul.mubr.msk.f32.gmra.mrb[2].mxu1 %vm188_vm1, %v1459_v14 }
 0x11c   :  { %1086 = vmatprep.mubr.msk.f32.mxu1 %vm188_vm1, %v1438_v5 }
 0x1ea   :  { %v1060_v22 = vpop.f32.mrb[0].mxu1 }
 0x1eb   :  { %v273_v23 = vadd.f32 %v1060_v22, %v949_v21  ;;  %v267_v24 = vpop.f32.mrb[1].mxu1 }
 0x1ec   :  { %v268_v25 = vadd.f32 %v949_v21, %v267_v24 }
 0x1ee   :  { %1216 = vtanh.f32 %v268_v25  ;;  %v1063_v26 = vpop.f32.mrb[2].mxu1 }
 0x1ef   :  { %1218 = vtanh.f32 %v273_v23  ;;  %v283_v27 = vadd.f32 %v1063_v26, %v949_v21  ;;  %v277_v28 = vpop.f32.mrb[3].mxu1 }
 0x1f0   :  { %v278_v29 = vadd.f32 %v949_v21, %v277_v28 }
 0x1f2   :  { %1220 = vtanh.f32 %v278_v29 }
 0x1f3   :  { %1222 = vtanh.f32 %v283_v27 }
 0x1f8   :  { %v1480_v30 = vpop.eup %1216 }
 0x1f9   :  { %v1482_v31 = vpop.eup %1218  ;;  %1072 = vmatprep.mubr.msk.f32.mxu0 %vm188_vm1, %v1480_v30 }
 0x1fa   :  { %1073 = vmatmul.mubr.msk.f32.vlgmr.msra.gmra.mrb[4].mxu0 %vm188_vm1, %v1482_v31 }
 0x1fb   :  { %1175 = vmatpush3.bf16.msra.mxu0 %v1172_v42 }
 0x1fc   :  { %v1488_v32 = vpop.eup %1220  ;;  %1177 = vmatprep.subr.bf16.mxu0 %v1176_v45 }
 0x1fd   :  { %v1490_v33 = vpop.eup %1222  ;;  %1075 = vmatprep.mubr.msk.f32.mxu0 %vm188_vm1, %v1488_v32 }
 0x1fe   :  { %1076 = vmatmul.mubr.msk.f32.gmra.mrb[6].mxu0 %vm188_vm1, %v1490_v33 }
 0x1ff   :  { %1179 = vmatpush3.bf16.msra.mxu0 %v1176_v45 }
 0x200   :  { %1189 = vmatprep.subr.bf16.mxu0 %v1188_v3 }
 0x2cd   :  { %v1074_v34 = vpop.f32.mrb[4].mxu0 }
 0x2ce   :  { %v372_v35 = vpop.f32.mrb[5].mxu0 }
 0x2cf   :  { %v1164_v36 = vpack.c.bf16 %v1074_v34, %v372_v35 }
 0x2d1   :  { %v1077_v37 = vpop.f32.mrb[6].mxu0  ;;  %1165 = vmatprep.subr.bf16.mxu1 %v1164_v36 }
 0x2d2   :  { %v382_v38 = vpop.f32.mrb[7].mxu0  ;;  %1167 = vmatpush3.bf16.msra.mxu1 %v1164_v36 }
 0x2d3   :  { %v1168_v39 = vpack.c.bf16 %v1077_v37, %v382_v38 }
 0x2d5   :  { %1169 = vmatprep.subr.bf16.mxu1 %v1168_v39 }
 0x2d6   :  { %1171 = vmatpush3.bf16.msra.mxu1 %v1168_v39 }
 0x2d9   :  { %1087 = vmatmul.mubr.msk.f32.vlgmr.msra.gmra.mrb[4].mxu1 %vm188_vm1, %v1445_v12 }
 0x2da   :  { %1089 = vmatprep.mubr.msk.f32.mxu1 %vm188_vm1, %v1450_v13 }
 0x2dd   :  { %1090 = vmatmul.mubr.msk.f32.gmra.mrb[6].mxu1 %vm188_vm1, %v1459_v14 }
 0x2de   :  { %1114 = vmatprep.mubr.msk.f32.mxu1 %vm188_vm1, %v1438_v5 }
 0x3ac   :  { %v1088_v47 = vpop.f32.mrb[4].mxu1 }
 0x3ad   :  { %v470_v48 = vadd.f32 %v1088_v47, %v958_v46  ;;  %v464_v49 = vpop.f32.mrb[5].mxu1 }
 0x3ae   :  { %v465_v50 = vadd.f32 %v958_v46, %v464_v49 }
 0x3af   :  { %1224 = vtanh.f32 %v470_v48 }
 0x3b0   :  { %1226 = vtanh.f32 %v465_v50  ;;  %v1091_v51 = vpop.f32.mrb[6].mxu1 }
 0x3b1   :  { %v480_v52 = vadd.f32 %v1091_v51, %v958_v46  ;;  %v474_v53 = vpop.f32.mrb[7].mxu1 }
 0x3b2   :  { %v475_v54 = vadd.f32 %v958_v46, %v474_v53 }
 0x3b3   :  { %1228 = vtanh.f32 %v480_v52 }
 0x3b4   :  { %1230 = vtanh.f32 %v475_v54 }
 0x3b9   :  { %v1225_v55 = vpop.eup %1224 }
 0x3ba   :  { %v1227_v56 = vpop.eup %1226  ;;  %883 = vrot.lane.b32.xlu0 %v1225_v55, %s1323_s13 }
 0x3bb   :  { %1100 = vmatprep.mubr.msk.f32.mxu0 %vm188_vm1, %v1227_v56 }
 0x3bc   :  { %1101 = vmatmul.mubr.msk.f32.vlgmr.msra.gmra.mrb[8].mxu0 %vm188_vm1, %v1225_v55 }
 0x3bd   :  { %v1229_v57 = vpop.eup %1228  ;;  %1191 = vmatpush3.bf16.msra.mxu0 %v1188_v3 }
 0x3be   :  { %v1231_v58 = vpop.eup %1230  ;;  %887 = vrot.lane.b32.xlu1 %v1229_v57, %s1323_s13  ;;  %881 = vrot.lane.b32.xlu0 %v1227_v56, %s1323_s13 }
 0x3bf   :  { %1103 = vmatprep.mubr.msk.f32.mxu0 %vm188_vm1, %v1231_v58  ;;  %1193 = vmatprep.subr.bf16.mxu0 %v1192_v7 }
 0x3c0   :  { %1104 = vmatmul.mubr.msk.f32.gmra.mrb[10].mxu0 %vm188_vm1, %v1229_v57 }
 0x3c1   :  { %1195 = vmatpush3.bf16.msra.mxu0 %v1192_v7 }
 0x3c2   :  { %885 = vrot.lane.b32.xlu1 %v1231_v58, %s1323_s13 }
 0x42c   :  { %v884_v44 = vpop.permute.xlu0 %883 }
 0x42d   :  { %v922_v51 = vsel %vm188_vm1, %v1482_v31, %v884_v44 }
 0x430   :  { %v888_v43 = vpop.permute.xlu1 %887  ;;  %v882_v46 = vpop.permute.xlu0 %881 }
 0x431   :  { %v921_v52 = vsel %vm188_vm1, %v1480_v30, %v882_v46  ;;  %v924_v31 = vsel %vm188_vm1, %v1490_v33, %v888_v43 }
 0x434   :  { %v886_v45 = vpop.permute.xlu1 %885 }
 0x435   :  { %v923_v30 = vsel %vm188_vm1, %v1488_v32, %v886_v45 }
 0x48f   :  { %v1102_v59 = vpop.f32.mrb[8].mxu0 }
 0x490   :  { %v569_v60 = vpop.f32.mrb[9].mxu0 }
 0x491   :  { %v1180_v61 = vpack.c.bf16 %v1102_v59, %v569_v60 }
 0x493   :  { %v1105_v62 = vpop.f32.mrb[10].mxu0  ;;  %1181 = vmatprep.subr.bf16.mxu1 %v1180_v61 }
 0x494   :  { %v579_v63 = vpop.f32.mrb[11].mxu0  ;;  %1183 = vmatpush3.bf16.msra.mxu1 %v1180_v61 }
 0x495   :  { %v1184_v0 = vpack.c.bf16 %v1105_v62, %v579_v63 }
 0x497   :  { %1185 = vmatprep.subr.bf16.mxu1 %v1184_v0 }
 0x498   :  { %1187 = vmatpush3.bf16.msra.mxu1 %v1184_v0 }
 0x49b   :  { %1115 = vmatmul.mubr.msk.f32.vlgmr.msra.gmra.mrb[8].mxu1 %vm188_vm1, %v1445_v12 }
 0x49c   :  { %1117 = vmatprep.mubr.msk.f32.mxu1 %vm188_vm1, %v1450_v13 }
 0x49f   :  { %1118 = vmatmul.mubr.msk.f32.gmra.mrb[10].mxu1 %vm188_vm1, %v1459_v14 }
 0x4a0   :  { %1145 = vmatprep.mubr.msk.f32.mxu1 %vm188_vm1, %v1450_v13 }
 0x56e   :  { %v1116_v9 = vpop.f32.mrb[8].mxu1 }
 0x56f   :  { %v667_v10 = vadd.f32 %v1116_v9, %v967_v8  ;;  %v661_v11 = vpop.f32.mrb[9].mxu1 }
 0x570   :  { %v662_v15 = vadd.f32 %v967_v8, %v661_v11 }
 0x571   :  { %1232 = vtanh.f32 %v667_v10 }
 0x572   :  { %1234 = vtanh.f32 %v662_v15  ;;  %v1119_v13 = vpop.f32.mrb[10].mxu1 }
 0x573   :  { %v677_v16 = vadd.f32 %v1119_v13, %v967_v8  ;;  %v671_v17 = vpop.f32.mrb[11].mxu1 }
 0x574   :  { %v672_v18 = vadd.f32 %v967_v8, %v671_v17 }
 0x575   :  { %1236 = vtanh.f32 %v677_v16 }
 0x576   :  { %1238 = vtanh.f32 %v672_v18 }
 0x57b   :  { %v1233_v19 = vpop.eup %1232 }
 0x57c   :  { %v1235_v20 = vpop.eup %1234  ;;  %895 = vrot.lane.b32.xlu1 %v1233_v19, %s1324_s16 }
 0x57d   :  { %893 = vrot.lane.b32.xlu0 %v1235_v20, %s1324_s16  ;;  %1128 = vmatprep.mubr.msk.f32.mxu0 %vm188_vm1, %v1235_v20 }
 0x57e   :  { %1129 = vmatmul.mubr.msk.f32.vlgmr.msra.gmra.mrb[12].mxu0 %vm188_vm1, %v1233_v19 }
 0x57f   :  { %v1237_v21 = vpop.eup %1236 }
 0x580   :  { %v1239_v22 = vpop.eup %1238  ;;  %899 = vrot.lane.b32.xlu1 %v1237_v21, %s1324_s16 }
 0x581   :  { %897 = vrot.lane.b32.xlu0 %v1239_v22, %s1324_s16  ;;  %1131 = vmatprep.mubr.msk.f32.mxu0 %vm188_vm1, %v1239_v22 }
 0x582   :  { %1132 = vmatmul.mubr.msk.f32.gmra.mrb[14].mxu0 %vm188_vm1, %v1237_v21 }
 0x583   :  { %1142 = vmatprep.mubr.msk.f32.mxu0 %vm188_vm1, %v1438_v5  ;;  %v976_v5 = vld [vmem:[%s1572_s9] ss:$0 sm:$0xff] }
 0x5ee   :  { %v896_v47 = vpop.permute.xlu1 %895 }
 0x5ef   :  { %v894_v48 = vpop.permute.xlu0 %893  ;;  %v927_v53 = vsel %vm925_vm2, %v922_v51, %v896_v47 }
 0x5f0   :  { %v926_v55 = vsel %vm925_vm2, %v921_v52, %v894_v48 }
 0x5f2   :  { %v900_v49 = vpop.permute.xlu1 %899 }
 0x5f3   :  { %v898_v50 = vpop.permute.xlu0 %897  ;;  %v929_v59 = vsel %vm925_vm2, %v924_v31, %v900_v49 }
 0x5f4   :  { %v928_v61 = vsel %vm925_vm2, %v923_v30, %v898_v50 }
 0x651   :  { %v1130_v23 = vpop.f32.mrb[12].mxu0 }
 0x652   :  { %v766_v24 = vpop.f32.mrb[13].mxu0 }
 0x653   :  { %v1196_v25 = vpack.c.bf16 %v1130_v23, %v766_v24 }
 0x655   :  { %v1133_v26 = vpop.f32.mrb[14].mxu0  ;;  %1197 = vmatprep.subr.bf16.mxu0 %v1196_v25  ;;  %1204 = vmatprep.subr.bf16.mxu1 %v1196_v25 }
 0x656   :  { %v776_v27 = vpop.f32.mrb[15].mxu0  ;;  %1199 = vmatpush3.bf16.msra.mxu0 %v1196_v25  ;;  %1206 = vmatpush3.bf16.msra.mxu1 %v1196_v25 }
 0x657   :  { %v1200_v28 = vpack.c.bf16 %v1133_v26, %v776_v27 }
 0x659   :  { %1201 = vmatprep.subr.bf16.mxu0 %v1200_v28  ;;  %1205 = vmatprep.subr.bf16.mxu1 %v1200_v28 }
 0x65a   :  { %1203 = vmatpush3.bf16.msra.mxu0 %v1200_v28  ;;  %1207 = vmatpush3.bf16.msra.mxu1 %v1200_v28 }
 0x65d   :  { %1143 = vmatmul.mubr.msk.f32.vlgmr.msra.gmra.mrb[16].mxu0 %vm188_vm1, %v1445_v12  ;;  %1146 = vmatmul.mubr.msk.f32.vlgmr.msra.gmra.mrb[12].mxu1 %vm188_vm1, %v1459_v14 }
 0x730   :  { %v1144_v29 = vpop.f32.mrb[16].mxu0  ;;  %v1147_v34 = vpop.f32.mrb[12].mxu1 }
 0x731   :  { %v864_v35 = vadd.f32 %v1144_v29, %v976_v5  ;;  %v858_v36 = vpop.f32.mrb[17].mxu0  ;;  %v874_v37 = vadd.f32 %v1147_v34, %v976_v5  ;;  %v868_v38 = vpop.f32.mrb[13].mxu1 }
 0x732   :  { %v859_v39 = vadd.f32 %v976_v5, %v858_v36  ;;  %v869_v40 = vadd.f32 %v976_v5, %v868_v38 }
 0x733   :  { %1240 = vtanh.f32 %v864_v35 }
 0x734   :  { %1242 = vtanh.f32 %v859_v39 }
 0x735   :  { %1244 = vtanh.f32 %v874_v37 }
 0x736   :  { %1246 = vtanh.f32 %v869_v40 }
 0x73d   :  { %v1241_v12 = vpop.eup %1240 }
 0x73e   :  { %v1243_v41 = vpop.eup %1242  ;;  %911 = vrot.lane.b32.xlu1 %v1241_v12, %s1325_s18 }
 0x73f   :  { %v1245_v14 = vpop.eup %1244  ;;  %909 = vrot.lane.b32.xlu0 %v1243_v41, %s1325_s18 }
 0x740   :  { %v1247_v42 = vpop.eup %1246 }
 0x742   :  { %915 = vrot.lane.b32.xlu1 %v1245_v14, %s1325_s18 }
 0x743   :  { %913 = vrot.lane.b32.xlu0 %v1247_v42, %s1325_s18 }
 0x7b0   :  { %v912_v54 = vpop.permute.xlu1 %911 }
 0x7b1   :  { %v932_v56 = vsel %vm930_vm3, %v927_v53, %v912_v54  ;;  %v910_v57 = vpop.permute.xlu0 %909 }
 0x7b2   :  { %936 = vst [vmem:[%s1573_s10 + $0x8] sm:$0xff] %v932_v56  ;;  %v931_v58 = vsel %vm930_vm3, %v926_v55, %v910_v57 }
 0x7b3   :  { %935 = vst [vmem:[%s1573_s10] sm:$0xff] %v931_v58 }
 0x7b4   :  { %v916_v60 = vpop.permute.xlu1 %915 }
 0x7b5   :  { %v934_v62 = vsel %vm930_vm3, %v929_v59, %v916_v60  ;;  %v914_v63 = vpop.permute.xlu0 %913 }
 0x7b6   :  { %938 = vst [vmem:[%s1573_s10 + $0x18] sm:$0xff] %v934_v62  ;;  %v933_v33 = vsel %vm930_vm3, %v928_v61, %v914_v63 }
 0x7b7   :  { %937 = vst [vmem:[%s1573_s10 + $0x10] sm:$0xff] %v933_v33 }
 0x7b8   :  { %943 = vsyncpa [#allocation3], 1 }
 0x7b9   :  { %944 = vsyncpa [#allocation5], 1 }

// kernel: dgcnn_forward.3
= control target key start
LH: loop header
LB: loop body
LE: loop exit
PB: predicated region body
PF: predicated region fallthrough
CT: control target
= control target key end

     0   :  { %v979_v0 = vmov 0.0|0.0   ;;  %vm980_vm0 = vmmov 0   ;;  %v981_v4 = vmov 0.0   ;;  %v982_v7 = vmov 1983009808   ;;  %s983_s26 = smov 32   ;;  %s1278_s1 = inlined_call_operand.vmem [shape: f32[128,16], index: 1, kind: input, shape index: {}]   ;;  %s1279_s0 = inlined_call_operand.vmem [shape: f32[2,10,128], index: 0, kind: input, shape index: {}]   ;;  %s1280_s3 = inlined_call_operand.vmem [shape: f32[80,32], index: 3, kind: input, shape index: {}]   ;;  %s1281_s2 = inlined_call_operand.vmem [shape: f32[1,16], index: 2, kind: input, shape index: {}]   ;;  %s1282_s5 = inlined_call_operand.vmem [shape: f32[32,128], index: 5, kind: input, shape index: {}]   ;;  %s1283_s4 = inlined_call_operand.vmem [shape: f32[1,32], index: 4, kind: input, shape index: {}]   ;;  %s1284_s7 = inlined_call_operand.vmem [shape: f32[128,8], index: 7, kind: input, shape index: {}]   ;;  %s1285_s6 = inlined_call_operand.vmem [shape: f32[1,128], index: 6, kind: input, shape index: {}]   ;;  %s1286_s8 = inlined_call_operand.vmem [shape: f32[1,8], index: 8, kind: input, shape index: {}]   ;;  %s1287_s9 = inlined_call_operand.vmem [shape: f32[2,8], index: 9, kind: output, shape index: {}]  }
   0x1   :  { %900 = vmatprep.subr.bf16.mxu0 %v979_v0  ;;  %v88_v1 = vld [vmem:[%s1278_s1] sm:$0xff]  ;;  %v89_v2 = vld [vmem:[%s1278_s1 + $0x8] sm:$0xff]  ;;  %v90_v3 = vld [vmem:[%s1278_s1 + $0x10] sm:$0xff]  ;;  %822 = vmatprep.mubr.msk.f32.mxu0 %vm980_vm0, %v981_v4  ;;  %v42_v8 = vunpack.c.l.s4 %v982_v7  ;;  %v44_v9 = vlaneseq  ;;  %vm382_vm1 = vcmask 1040384   ;;  %vm385_vm2 = vcmask 1041408   ;;  %s984_s27 = smov 16  }
   0x2   :  { %v901_v5 = vpack.c.bf16 %v89_v2, %v88_v1  ;;  %v91_v6 = vld [vmem:[%s1278_s1 + $0x18] sm:$0xff]  ;;  %939 = vmatprep.subr.bf16.mxu1 %v979_v0  ;;  %862 = vmatprep.mubr.msk.f32.mxu1 %vm980_vm0, %v981_v4  ;;  %v92_v11 = vld [vmem:[%s1278_s1 + $0x20] sm:$0xff]  ;;  %v93_v12 = vld [vmem:[%s1278_s1 + $0x28] sm:$0xff]  ;;  %vm388_vm3 = vcmask 1042432   ;;  %vm391_vm4 = vcmask 1043456   ;;  %s985_s29 = smov 48  }
   0x3   :  { %v904_v10 = vpack.c.bf16 %v91_v6, %v90_v3  ;;  %v43_v13 = vunpack.c.0.s8 %v42_v8  ;;  %v1062_v14 = vshrl.u32 %v44_v9, 7  ;;  %v907_v15 = vpack.c.bf16 %v93_v12, %v92_v11  ;;  %v32_v16 = vld [vmem:[%s1279_s0] sm:$0xff]  ;;  %v94_v17 = vld [vmem:[%s1278_s1 + $0x30] sm:$0xff]  ;;  %v95_v18 = vld [vmem:[%s1278_s1 + $0x38] sm:$0xff]  ;;  %s986_s30 = smov 64  }
   0x4   :  { %902 = vmatpush3.bf16.msra.mxu0 %v901_v5  ;;  %v40_v19 = vcombine.high %v32_v16, %v32_v16  ;;  %v910_v21 = vpack.c.bf16 %v95_v18, %v94_v17  ;;  %v96_v22 = vld [vmem:[%s1278_s1 + $0x40] sm:$0xff]  ;;  %v97_v23 = vld [vmem:[%s1278_s1 + $0x48] sm:$0xff]  ;;  %v34_v27 = vld [vmem:[%s1279_s0 + $0x10] sm:$0xff]  ;;  %vm428_vm5 = vcmask 130048   ;;  %vm434_vm6 = vcmask 392192  }
   0x5   :  { %903 = vmatprep.subr.bf16.mxu0 %v979_v0  ;;  %v1075_v20 = vsub.s32 %v43_v13, %v1062_v14  ;;  %v913_v26 = vpack.c.bf16 %v97_v23, %v96_v22  ;;  %v98_v28 = vld [vmem:[%s1278_s1 + $0x50] sm:$0xff]  ;;  %v99_v29 = vld [vmem:[%s1278_s1 + $0x58] sm:$0xff]  ;;  %v64_v32 = vcombine.high %v34_v27, %v34_v27  ;;  %v100_v35 = vld [vmem:[%s1278_s1 + $0x60] sm:$0xff]  ;;  %v1144_v13 = vsub.s32 0, %v1062_v14 }
   0x6   :  { %v916_v34 = vpack.c.bf16 %v99_v29, %v98_v28  ;;  %v101_v36 = vld [vmem:[%s1278_s1 + $0x68] sm:$0xff]  ;;  %v102_v43 = vld [vmem:[%s1278_s1 + $0x70] sm:$0xff]  ;;  %v103_v44 = vld [vmem:[%s1278_s1 + $0x78] sm:$0xff]  ;;  %vm431_vm7 = vcmask 261120   ;;  %vm437_vm8 = vcmask 523264   ;;  %vm460_vm9 = vcmask 1041409  }
   0x7   :  { %v47_v24 = vrot.slane %v32_v16, %v1075_v20  ;;  %v54_v25 = vrot.slane %v40_v19, %v1075_v20  ;;  %v71_v33 = vrot.slane %v34_v27, %v1075_v20  ;;  %v78_v39 = vrot.slane %v64_v32, %v1075_v20  ;;  %v720_v42 = vld.sshfl [vmem:[%s1279_s0 + $0x8] sm:$0x3 pattern:$0x76325410]  ;;  %v440_v58 = vld [vmem:[%s1280_s3] sm:$0xff]  ;;  %v442_v16 = vld [vmem:[%s1280_s3 + $0x10] sm:$0xff] }
   0x8   :  { %905 = vmatpush3.bf16.msra.mxu0 %v904_v10  ;;  %v919_v41 = vpack.c.bf16 %v101_v36, %v100_v35  ;;  %v922_v49 = vpack.c.bf16 %v103_v44, %v102_v43  ;;  %v721_v54 = vld.sshfl [vmem:[%s1279_s0 + $0x18] sm:$0x3 pattern:$0x76325410]  ;;  %v441_v59 = vld [vmem:[%s1280_s3 + $0x8] sm:$0xff]  ;;  %vm462_vm10 = vcmask 654336  }
   0x9   :  { %906 = vmatprep.subr.bf16.mxu0 %v979_v0  ;;  %v55_v30 = vcombine.high %v47_v24, %v47_v24  ;;  %v56_v31 = vcombine.high %v54_v25, %v54_v25  ;;  %v79_v40 = vcombine.high %v71_v33, %v71_v33  ;;  %v128_v47 = vcombine.low %v720_v42, %v71_v33  ;;  %v722_v61 = vld [vmem:[%s1281_s2] ss:$0 sm:$0xff]  ;;  %v443_v17 = vld [vmem:[%s1280_s3 + $0x18] sm:$0xff]  ;;  %v445_v35 = vld [vmem:[%s1280_s3 + $0x28] sm:$0xff] }
   0xa   :  { %v80_v53 = vcombine.high %v78_v39, %v78_v39  ;;  %v925_v60 = vpack.c.bf16 %v441_v59, %v440_v58  ;;  %vm714_vm11 = vcmask 58368  }
   0xb   :  { %v111_v37 = vcombine.low %v47_v24, %v55_v30  ;;  %v112_v38 = vcombine.low %v54_v25, %v56_v31  ;;  %v129_v48 = vcombine.low %v79_v40, %v78_v39  ;;  %v136_v51 = vrot.slane %v128_v47, %v1075_v20 }
   0xc   :  { %908 = vmatpush3.bf16.msra.mxu0 %v907_v15  ;;  %v145_v56 = vcombine.low %v80_v53, %v721_v54  ;;  %v928_v25 = vpack.c.bf16 %v443_v17, %v442_v16  ;;  %v536_v17 = vld [vmem:[%s1282_s5] sm:$0xff] }
   0xd   :  { %909 = vmatprep.subr.bf16.mxu0 %v979_v0  ;;  %v119_v45 = vrot.slane %v111_v37, %v1075_v20  ;;  %v126_v46 = vrot.slane %v112_v38, %v1075_v20  ;;  %v143_v52 = vrot.slane %v129_v48, %v1075_v20 }
   0xe   :  { %v152_v57 = vrot.slane %v145_v56, %v1075_v20 }
   0xf   :  { %v127_v50 = vcombine.low %v119_v45, %v126_v46  ;;  %v144_v55 = vcombine.low %v136_v51, %v143_v52  ;;  %v447_v51 = vld [vmem:[%s1280_s3 + $0x38] sm:$0xff] }
  0x10   :  { %911 = vmatpush3.bf16.msra.mxu0 %v910_v21 }
  0x11   :  { %912 = vmatprep.subr.bf16.mxu0 %v979_v0 }
  0x14   :  { %914 = vmatpush3.bf16.msra.mxu0 %v913_v26 }
  0x15   :  { %915 = vmatprep.subr.bf16.mxu0 %v979_v0 }
  0x18   :  { %917 = vmatpush3.bf16.msra.mxu0 %v916_v34  ;;  %v444_v34 = vld [vmem:[%s1280_s3 + $0x20] sm:$0xff] }
  0x19   :  { %918 = vmatprep.subr.bf16.mxu0 %v979_v0  ;;  %v931_v39 = vpack.c.bf16 %v445_v35, %v444_v34 }
  0x1c   :  { %920 = vmatpush3.bf16.msra.mxu0 %v919_v41 }
  0x1d   :  { %921 = vmatprep.subr.bf16.mxu0 %v979_v0 }
  0x20   :  { %923 = vmatpush3.bf16.msra.mxu0 %v922_v49 }
  0x21   :  { %924 = vmatprep.subr.bf16.mxu0 %v979_v0 }
  0x23   :  { %823 = vmatmul.mubr.f32.vlgmr.msra.gmra.mrb[0].mxu0 %v127_v50  ;;  %v446_v50 = vld [vmem:[%s1280_s3 + $0x30] sm:$0xff] }
  0x24   :  { %825 = vmatprep.mubr.msk.f32.mxu0 %vm980_vm0, %v981_v4  ;;  %926 = vmatpush3.bf16.msra.mxu0 %v925_v60 }
  0x25   :  { %927 = vmatprep.subr.bf16.mxu0 %v979_v0 }
  0x27   :  { %826 = vmatmul.mubr.f32.gmra.mrb[2].mxu0 %v144_v55 }
  0x28   :  { %828 = vmatprep.mubr.msk.f32.mxu0 %vm980_vm0, %v981_v4  ;;  %929 = vmatpush3.bf16.msra.mxu0 %v928_v25 }
  0x29   :  { %930 = vmatprep.subr.bf16.mxu0 %v979_v0 }
  0x2b   :  { %829 = vmatmul.mubr.f32.gmra.mrb[4].mxu0 %v152_v57 }
  0x2c   :  { %851 = vmatprep.mubr.msk.f32.mxu0 %vm980_vm0, %v981_v4  ;;  %932 = vmatpush3.bf16.msra.mxu0 %v931_v39 }
  0x2d   :  { %933 = vmatprep.subr.bf16.mxu0 %v979_v0 }
  0xf6   :  { %v222_v62 = vpop.f32.mrb[0].mxu0 }
  0xf7   :  { %v223_v63 = vadd.f32 %v722_v61, %v222_v62  ;;  %v824_v1 = vpop.f32.mrb[1].mxu0 }
  0xf9   :  { %v236_v2 = vmax.f32 %v223_v63, 0.0 }
  0xfa   :  { %v227_v3 = vpop.f32.mrb[2].mxu0 }
  0xfb   :  { %v242_v5 = vcombine.high %v236_v2, %v236_v2  ;;  %v249_v6 = vrot.slane %v236_v2, %v1075_v20  ;;  %v228_v7 = vadd.f32 %v722_v61, %v227_v3  ;;  %v827_v8 = vpop.f32.mrb[3].mxu0  ;;  %v448_v3 = vld [vmem:[%s1280_s3 + $0x40] sm:$0xff] }
  0xfd   :  { %v256_v9 = vrot.slane %v242_v5, %v1075_v20  ;;  %v257_v10 = vcombine.high %v249_v6, %v249_v6  ;;  %v723_v11 = vrot.slane %v249_v6, 9  ;;  %v237_v12 = vmax.f32 %v228_v7, 0.0  ;;  %v449_v5 = vld [vmem:[%s1280_s3 + $0x48] sm:$0xff] }
  0xfe   :  { %v232_v15 = vpop.f32.mrb[4].mxu0 }
  0xff   :  { %v258_v18 = vcombine.high %v256_v9, %v256_v9  ;;  %v725_v19 = vrot.slane %v257_v10, 9  ;;  %v727_v21 = vrot.slane %v256_v9, 9  ;;  %v830_v22 = vpop.f32.mrb[5].mxu0  ;;  %v259_v23 = vcombine.high %v237_v12, %v237_v12 }
 0x100   :  { %v266_v24 = vrot.slane %v237_v12, %v1075_v20  ;;  %v233_v14 = vadd.f32 %v722_v61, %v232_v15  ;;  %v300_v26 = vmax.f32 %v249_v6, %v723_v11 }
 0x101   :  { %v308_v27 = vmax.f32 %v257_v10, %v725_v19  ;;  %v316_v28 = vmax.f32 %v256_v9, %v727_v21  ;;  %v729_v29 = vrot.slane %v258_v18, 9  ;;  %v273_v30 = vrot.slane %v259_v23, %v1075_v20 }
 0x102   :  { %v274_v31 = vcombine.high %v266_v24, %v266_v24  ;;  %v731_v32 = vrot.slane %v266_v24, 9  ;;  %v238_v33 = vmax.f32 %v233_v14, 0.0  ;;  %v937_v9 = vpack.c.bf16 %v449_v5, %v448_v3  ;;  %v634_v3 = vld [vmem:[%s1284_s7 + $0x68] sm:$0xff] }
 0x103   :  { %v324_v36 = vmax.f32 %v258_v18, %v729_v29  ;;  %v339_v37 = vrot.slane %v308_v27, %v1144_v13  ;;  %v351_v38 = vrot.slane %v316_v28, %v1144_v13  ;;  %v275_v40 = vcombine.high %v273_v30, %v273_v30  ;;  %v537_v18 = vld [vmem:[%s1282_s5 + $0x8] sm:$0xff] }
 0x104   :  { %v724_v41 = vrot.slane %v274_v31, 9  ;;  %v726_v42 = vrot.slane %v273_v30, 9  ;;  %v332_v43 = vmax.f32 %v266_v24, %v731_v32  ;;  %v282_v46 = vrot.slane %v238_v33, %v1075_v20 }
 0x105   :  { %v363_v44 = vrot.slane %v324_v36, %v1144_v13  ;;  %v383_v45 = vsel %vm382_vm1, %v300_v26, %v339_v37  ;;  %v728_v48 = vrot.slane %v275_v40, 9  ;;  %v934_v20 = vpack.c.bf16 %v447_v51, %v446_v50 }
 0x106   :  { %v309_v47 = vmax.f32 %v273_v30, %v726_v42  ;;  %v375_v49 = vrot.slane %v332_v43, %v1144_v13  ;;  %v283_v52 = vcombine.high %v282_v46, %v282_v46  ;;  %v730_v53 = vrot.slane %v282_v46, 9  ;;  %v539_v42 = vld [vmem:[%s1282_s5 + $0x18] sm:$0xff] }
 0x107   :  { %v386_v54 = vsel %vm385_vm2, %v383_v45, %v351_v38  ;;  %v301_v55 = vmax.f32 %v274_v31, %v724_v41  ;;  %v317_v56 = vmax.f32 %v275_v40, %v728_v48  ;;  %935 = vmatpush3.bf16.msra.mxu0 %v934_v20  ;;  %v940_v19 = vpack.c.bf16 %v537_v18, %v536_v17  ;;  %v538_v41 = vld [vmem:[%s1282_s5 + $0x10] sm:$0xff]  ;;  %v621_v45 = vld [vmem:[%s1284_s7] sm:$0xff] }
 0x108   :  { %v343_v57 = vrot.slane %v309_v47, %v1144_v13  ;;  %v389_v58 = vsel %vm388_vm3, %v386_v54, %v363_v44  ;;  %v325_v59 = vmax.f32 %v282_v46, %v730_v53  ;;  %v732_v60 = vrot.slane %v283_v52, 9  ;;  %936 = vmatprep.subr.bf16.mxu0 %v979_v0  ;;  %v733_v44 = vld [vmem:[%s1283_s4] ss:$0 sm:$0xff]  ;;  %v622_v46 = vld [vmem:[%s1284_s7 + $0x8] sm:$0xff]  ;;  %v624_v53 = vld [vmem:[%s1284_s7 + $0x18] sm:$0xff] }
 0x109   :  { %v392_v61 = vsel %vm391_vm4, %v389_v58, %v375_v49  ;;  %v355_v62 = vrot.slane %v317_v56, %v1144_v13  ;;  %941 = vmatpush3.bf16.msra.mxu1 %v940_v19  ;;  %v943_v43 = vpack.c.bf16 %v539_v42, %v538_v41  ;;  %v946_v50 = vpack.c.bf16 %v622_v46, %v621_v45  ;;  %v625_v20 = vld [vmem:[%s1284_s7 + $0x20] sm:$0xff] }
 0x10a   :  { %v384_v63 = vsel %vm382_vm1, %v301_v55, %v343_v57  ;;  %v404_v1 = vrot.slane %v392_v61, 2  ;;  %v396_v2 = vrot.slane %v392_v61, 1  ;;  %v333_v6 = vmax.f32 %v283_v52, %v732_v60  ;;  %942 = vmatprep.subr.bf16.mxu1 %v979_v0  ;;  %v623_v52 = vld [vmem:[%s1284_s7 + $0x10] sm:$0xff]  ;;  %v626_v55 = vld [vmem:[%s1284_s7 + $0x28] sm:$0xff] }
 0x10b   :  { %v367_v7 = vrot.slane %v325_v59, %v1144_v13  ;;  %v387_v8 = vsel %vm385_vm2, %v384_v63, %v355_v62  ;;  %938 = vmatpush3.bf16.msra.mxu0 %v937_v9  ;;  %v420_v22 = vrot.slane %v392_v61, 4  ;;  %v412_v23 = vrot.slane %v392_v61, 3  ;;  %v627_v57 = vld [vmem:[%s1284_s7 + $0x30] sm:$0xff]  ;;  %v629_v59 = vld [vmem:[%s1284_s7 + $0x40] sm:$0xff]  ;;  %v630_v60 = vld [vmem:[%s1284_s7 + $0x48] sm:$0xff] }
 0x10c   :  { %406 = vrot.lane.b32.xlu0 %v404_v1, %s983_s26  ;;  %398 = vrot.lane.b32.xlu1 %v396_v2, %s984_s27  ;;  %v379_v10 = vrot.slane %v333_v6, %v1144_v13  ;;  %v949_v54 = vpack.c.bf16 %v624_v53, %v623_v52  ;;  %v952_v56 = vpack.c.bf16 %v626_v55, %v625_v20  ;;  %v631_v62 = vld [vmem:[%s1284_s7 + $0x50] sm:$0xff]  ;;  %v632_v63 = vld [vmem:[%s1284_s7 + $0x58] sm:$0xff] }
 0x10d   :  { %v390_v11 = vsel %vm388_vm3, %v387_v8, %v367_v7  ;;  %944 = vmatpush3.bf16.msra.mxu1 %v943_v43  ;;  %v961_v1 = vpack.c.bf16 %v632_v63, %v631_v62  ;;  %v633_v2 = vld [vmem:[%s1284_s7 + $0x60] sm:$0xff]  ;;  %v635_v6 = vld [vmem:[%s1284_s7 + $0x70] sm:$0xff]  ;;  %v636_v7 = vld [vmem:[%s1284_s7 + $0x78] sm:$0xff] }
 0x10e   :  { %v393_v12 = vsel %vm391_vm4, %v390_v11, %v379_v10  ;;  %945 = vmatprep.subr.bf16.mxu1 %v979_v0  ;;  %v964_v5 = vpack.c.bf16 %v634_v3, %v633_v2  ;;  %v967_v8 = vpack.c.bf16 %v636_v7, %v635_v6  ;;  %v735_v9 = vld [vmem:[%s1285_s6] ss:$0 sm:$0xff] }
 0x10f   :  { %v413_v15 = vrot.slane %v393_v12, 3  ;;  %v397_v16 = vrot.slane %v393_v12, 1  ;;  %v421_v13 = vrot.slane %v393_v12, 4  ;;  %v405_v21 = vrot.slane %v393_v12, 2 }
 0x111   :  { %416 = vrot.lane.b32.xlu1 %v413_v15, %s985_s29  ;;  %400 = vrot.lane.b32.xlu0 %v397_v16, %s984_s27 }
 0x115   :  { %424 = vrot.lane.b32.xlu1 %v421_v13, %s986_s30  ;;  %408 = vrot.lane.b32.xlu0 %v405_v21, %s983_s26 }
 0x119   :  { %422 = vrot.lane.b32.xlu1 %v420_v22, %s986_s30  ;;  %414 = vrot.lane.b32.xlu0 %v412_v23, %s985_s29 }
 0x17e   :  { %v407_v24 = vpop.permute.xlu0 %406  ;;  %v399_v14 = vpop.permute.xlu1 %398 }
 0x17f   :  { %v429_v30 = vsel %vm428_vm5, %v392_v61, %v399_v14  ;;  %v958_v61 = vpack.c.bf16 %v630_v60, %v629_v59 }
 0x180   :  { %v432_v36 = vsel %vm431_vm7, %v429_v30, %v407_v24 }
 0x183   :  { %v417_v25 = vpop.permute.xlu1 %416  ;;  %v401_v26 = vpop.permute.xlu0 %400 }
 0x184   :  { %v430_v27 = vsel %vm428_vm5, %v393_v12, %v401_v26 }
 0x187   :  { %v425_v28 = vpop.permute.xlu1 %424  ;;  %v409_v29 = vpop.permute.xlu0 %408 }
 0x188   :  { %v433_v31 = vsel %vm431_vm7, %v430_v27, %v409_v29 }
 0x189   :  { %v436_v32 = vsel %vm434_vm6, %v433_v31, %v417_v25 }
 0x18a   :  { %v439_v33 = vsel %vm437_vm8, %v436_v32, %v425_v28 }
 0x18b   :  { %v459_v34 = vrot.slane %v439_v33, 7  ;;  %v423_v35 = vpop.permute.xlu1 %422  ;;  %v415_v37 = vpop.permute.xlu0 %414 }
 0x18c   :  { %v435_v38 = vsel %vm434_vm6, %v432_v36, %v415_v37 }
 0x18d   :  { %v438_v39 = vsel %vm437_vm8, %v435_v38, %v423_v35 }
 0x18e   :  { %v461_v40 = vsel %vm460_vm9, %v459_v34, %v438_v39 }
 0x18f   :  { %852 = vmatmul.mubr.msk.f32.vlgmr.msra.gmra.mrb[6].mxu0 %vm462_vm10, %v461_v40 }
 0x262   :  { %v531_v47 = vpop.f32.mrb[6].mxu0 }
 0x263   :  { %v532_v48 = vadd.f32 %v733_v44, %v531_v47  ;;  %v853_v49 = vpop.f32.mrb[7].mxu0 }
 0x265   :  { %v535_v51 = vmax.f32 %v532_v48, 0.0 }
 0x267   :  { %863 = vmatmul.mubr.msk.f32.vlgmr.msra.gmra.mrb[0].mxu1 %vm431_vm7, %v535_v51 }
 0x268   :  { %947 = vmatpush3.bf16.msra.mxu1 %v946_v50  ;;  %897 = vmatprep.mubr.msk.f32.mxu1 %vm980_vm0, %v981_v4  ;;  %v628_v4 = vld [vmem:[%s1284_s7 + $0x38] sm:$0xff] }
 0x269   :  { %948 = vmatprep.subr.bf16.mxu1 %v979_v0  ;;  %v955_v58 = vpack.c.bf16 %v628_v4, %v627_v57 }
 0x26c   :  { %950 = vmatpush3.bf16.msra.mxu1 %v949_v54 }
 0x26d   :  { %951 = vmatprep.subr.bf16.mxu1 %v979_v0 }
 0x270   :  { %953 = vmatpush3.bf16.msra.mxu1 %v952_v56 }
 0x271   :  { %954 = vmatprep.subr.bf16.mxu1 %v979_v0 }
 0x274   :  { %956 = vmatpush3.bf16.msra.mxu1 %v955_v58 }
 0x275   :  { %957 = vmatprep.subr.bf16.mxu1 %v979_v0 }
 0x278   :  { %959 = vmatpush3.bf16.msra.mxu1 %v958_v61 }
 0x279   :  { %960 = vmatprep.subr.bf16.mxu1 %v979_v0 }
 0x27c   :  { %962 = vmatpush3.bf16.msra.mxu1 %v961_v1 }
 0x27d   :  { %963 = vmatprep.subr.bf16.mxu1 %v979_v0 }
 0x280   :  { %965 = vmatpush3.bf16.msra.mxu1 %v964_v5 }
 0x281   :  { %966 = vmatprep.subr.bf16.mxu1 %v979_v0  ;;  %v737_v0 = vld [vmem:[%s1286_s8] ss:$0 sm:$0xff] }
 0x284   :  { %968 = vmatpush3.bf16.msra.mxu1 %v967_v8 }
 0x33a   :  { %v616_v10 = vpop.f32.mrb[0].mxu1 }
 0x33b   :  { %v617_v11 = vadd.f32 %v735_v9, %v616_v10  ;;  %v864_v12 = vpop.f32.mrb[1].mxu1 }
 0x33d   :  { %v620_v15 = vmax.f32 %v617_v11, 0.0 }
 0x33f   :  { %898 = vmatmul.mubr.f32.vlgmr.msra.gmra.mrb[2].mxu1 %v620_v15 }
 0x412   :  { %v710_v16 = vpop.f32.mrb[2].mxu1 }
 0x413   :  { %v711_v17 = vadd.f32 %v737_v0, %v710_v16  ;;  %v899_v18 = vpop.f32.mrb[3].mxu1 }
 0x415   :  { %715 = vst.msk [vmem:[%s1287_s9] sm:$0x3] %vm714_vm11, %v711_v17 }

</bundles_post_ra>
